<compile_context>
chip_gen: v7x
topology: tpu7x:2x2x1
jax: 0.10.0
libtpu: 0.0.40
codegen_flags: <defaults>
</compile_context>

<pallas_src>
import functools

import jax
import jax.numpy as jnp
from jax.experimental import pallas as pl
from jax.experimental.pallas import tpu as pltpu


def _round_up(n, m):
    return (n + m - 1) // m * m


def se_connect_kernel(x_ref, w1t_ref, b1_ref, w2t_ref, b2_ref, o_ref, *, inv_t):
    # x_ref: (1, Cp, Tp) -- one batch element per grid step.
    x = x_ref[...]
    xf = x.astype(jnp.float32)

    # Squeeze: mean over time.  Padded time columns are zero, so sum * (1/T_real)
    # is exact; 1/T is a baked-in constant (no per-step divide).
    m = jnp.sum(xf, axis=2) * inv_t                                   # (1, Cp)

    # Excitation MLP (weights pre-transposed in the wrapper).
    h = jnp.dot(m, w1t_ref[...], preferred_element_type=jnp.float32) + b1_ref[...]
    h = jnp.maximum(h, 0.0)
    g = jnp.dot(h, w2t_ref[...], preferred_element_type=jnp.float32) + b2_ref[...]
    g = jax.nn.sigmoid(g)                                             # (1, Cp)

    # Excitation: scale every time step by the per-channel gate.
    o_ref[...] = (xf * g[:, :, None]).astype(o_ref.dtype)


def se_connect(x, w1, b1, w2, b2):
    """SE_Connect forward.

    x:  (B, C, T)
    w1: (H, C), b1: (H,)   -- linear1 (C -> H = C // s)
    w2: (C, H), b2: (C,)   -- linear2 (H -> C)
    """
    B, C, T = x.shape
    H = w1.shape[0]

    b1 = b1.reshape(1, H)
    b2 = b2.reshape(1, C)

    # Pad C to a sublane multiple (8) and T to a lane multiple (128) so stores are
    # unmasked full-width vst's and vregs are not padded.  Zero padding keeps the
    # math exact (padded channels/time contribute 0 to the sum; padded outputs are
    # dropped at the end).
    Cp = _round_up(C, 8)
    Tp = _round_up(T, 128)

    xp = x
    if (Cp, Tp) != (C, T):
        xp = jnp.pad(x, ((0, 0), (0, Cp - C), (0, Tp - T)))

    # Pre-transposed (and channel-padded) weights: w1t (Cp, H), w2t (H, Cp).
    w1t = w1.T
    w2t = w2.T
    b2p = b2
    if Cp != C:
        w1t = jnp.pad(w1t, ((0, Cp - C), (0, 0)))
        w2t = jnp.pad(w2t, ((0, 0), (0, Cp - C)))
        b2p = jnp.pad(b2, ((0, 0), (0, Cp - C)))

    itemsize = jnp.dtype(x.dtype).itemsize
    block_bytes = Cp * Tp * itemsize
    weight_bytes = (w1t.size + w2t.size + b1.size + b2p.size) * 4
    # 2 double-buffered input blocks + 2 output blocks + weights + headroom,
    # clamped to a sane range.
    vmem_limit = int(
        min(max(4 * block_bytes + weight_bytes + (4 << 20), 32 << 20), 100 << 20)
    )

    kernel = functools.partial(se_connect_kernel, inv_t=1.0 / T)

    out = pl.pallas_call(
        kernel,
        out_shape=jax.ShapeDtypeStruct((B, Cp, Tp), x.dtype),
        grid=(B,),
        in_specs=[
            pl.BlockSpec((1, Cp, Tp), lambda b: (b, 0, 0)),
            pl.BlockSpec((Cp, H), lambda b: (0, 0)),
            pl.BlockSpec((1, H), lambda b: (0, 0)),
            pl.BlockSpec((H, Cp), lambda b: (0, 0)),
            pl.BlockSpec((1, Cp), lambda b: (0, 0)),
        ],
        out_specs=pl.BlockSpec((1, Cp, Tp), lambda b: (b, 0, 0)),
        compiler_params=pltpu.CompilerParams(
            dimension_semantics=("parallel",),
            vmem_limit_bytes=vmem_limit,
        ),
        cost_estimate=pl.CostEstimate(
            flops=2 * B * (C * H + H * C) + 2 * B * C * T,
            transcendentals=B * C,
            bytes_accessed=2 * B * Cp * Tp * itemsize + weight_bytes,
        ),
    )(xp, w1t, b1, w2t, b2p)

    if (Cp, Tp) != (C, T):
        out = out[:, :C, :T]
    return out


def se_connect_ref(x, w1, b1, w2, b2):
    """Pure-JAX reference matching the PyTorch forward exactly."""
    m = x.mean(axis=2)
    h = jax.nn.relu(m @ w1.T + b1)
    g = jax.nn.sigmoid(h @ w2.T + b2)
    return x * g[:, :, None]


if __name__ == "__main__":
    # Small shapes consistent with SE_Connect(channels=16, s=2) on (B, C, T) input.
    # T=200 is not a lane multiple on purpose, to exercise the padding path.
    B, C, T, S = 2, 16, 200, 2
    H = C // S

    key = jax.random.PRNGKey(0)
    kx, k1, k2, k3, k4 = jax.random.split(key, 5)

    x = jax.random.normal(kx, (B, C, T), dtype=jnp.float32)

    # Deterministic parameter init (PyTorch-Linear-style uniform ranges).
    bound1 = 1.0 / (C ** 0.5)
    bound2 = 1.0 / (H ** 0.5)
    w1 = jax.random.uniform(k1, (H, C), jnp.float32, -bound1, bound1)
    b1 = jax.random.uniform(k2, (H,), jnp.float32, -bound1, bound1)
    w2 = jax.random.uniform(k3, (C, H), jnp.float32, -bound2, bound2)
    b2 = jax.random.uniform(k4, (C,), jnp.float32, -bound2, bound2)

    out = se_connect(x, w1, b1, w2, b2)
    out = jax.block_until_ready(out)

    ref = se_connect_ref(x, w1, b1, w2, b2)
    assert out.shape == (B, C, T)
    assert jnp.allclose(out, ref, atol=1e-5, rtol=1e-5), "mismatch vs reference"

    print("KERNEL_OK")
</pallas_src>

<mosaic_0001>
module attributes {stable_mosaic.version = 11 : i64} {
  func.func @se_connect_kernel(%arg0: i32, %arg1: memref<1x16x256xf32, #tpu.memory_space<vmem>>, %arg2: memref<16x8xf32, #tpu.memory_space<vmem>>, %arg3: memref<1x8xf32, #tpu.memory_space<vmem>>, %arg4: memref<8x16xf32, #tpu.memory_space<vmem>>, %arg5: memref<1x16xf32, #tpu.memory_space<vmem>>, %arg6: memref<1x16x256xf32, #tpu.memory_space<vmem>>) attributes {dimension_semantics = [#tpu.dimension_semantics<parallel>], iteration_bounds = array<i64: 2>, scalar_prefetch = 0 : i64, scratch_operands = 0 : i64, tpu.core_type = #tpu.core_type<tc>, window_params = [{transform_indices = @transform_0, window_bounds = array<i64: 1, 16, 256>}, {pipeline_mode = #tpu.pipeline_mode<synchronous>, transform_indices = @transform_1, window_bounds = array<i64: 16, 8>}, {pipeline_mode = #tpu.pipeline_mode<synchronous>, transform_indices = @transform_2, window_bounds = array<i64: 1, 8>}, {pipeline_mode = #tpu.pipeline_mode<synchronous>, transform_indices = @transform_3, window_bounds = array<i64: 8, 16>}, {pipeline_mode = #tpu.pipeline_mode<synchronous>, transform_indices = @transform_4, window_bounds = array<i64: 1, 16>}, {transform_indices = @transform_5, window_bounds = array<i64: 1, 16, 256>}]} {
    %c0 = arith.constant 0 : index
    %c0_0 = arith.constant 0 : index
    %c0_1 = arith.constant 0 : index
    %0 = vector.load %arg1[%c0, %c0_0, %c0_1] : memref<1x16x256xf32, #tpu.memory_space<vmem>>, vector<1x16x256xf32>
    %cst = arith.constant dense<0.000000e+00> : vector<1x16xf32>
    %1 = vector.multi_reduction <add>, %0, %cst [2] : vector<1x16x256xf32> to vector<1x16xf32>
    %cst_2 = arith.constant 5.000000e-03 : f32
    %2 = vector.broadcast %cst_2 : f32 to vector<1x16xf32>
    %3 = arith.mulf %1, %2 : vector<1x16xf32>
    %c0_3 = arith.constant 0 : index
    %c0_4 = arith.constant 0 : index
    %4 = vector.load %arg2[%c0_3, %c0_4] : memref<16x8xf32, #tpu.memory_space<vmem>>, vector<16x8xf32>
    %cst_5 = arith.constant dense<0.000000e+00> : vector<1x8xf32>
    %5 = tpu.matmul %3, %4, %cst_5 {dimension_numbers = #tpu.dot_dimension_numbers<[1], [0], [0], [1], [0, 0, 1, 1], [], []>} : vector<1x16xf32>, vector<16x8xf32>, vector<1x8xf32> -> vector<1x8xf32>
    %c0_6 = arith.constant 0 : index
    %c0_7 = arith.constant 0 : index
    %6 = vector.load %arg3[%c0_6, %c0_7] : memref<1x8xf32, #tpu.memory_space<vmem>>, vector<1x8xf32>
    %7 = arith.addf %5, %6 : vector<1x8xf32>
    %cst_8 = arith.constant 0.000000e+00 : f32
    %8 = vector.broadcast %cst_8 : f32 to vector<1x8xf32>
    %9 = arith.maximumf %7, %8 : vector<1x8xf32>
    %c0_9 = arith.constant 0 : index
    %c0_10 = arith.constant 0 : index
    %10 = vector.load %arg4[%c0_9, %c0_10] : memref<8x16xf32, #tpu.memory_space<vmem>>, vector<8x16xf32>
    %cst_11 = arith.constant dense<0.000000e+00> : vector<1x16xf32>
    %11 = tpu.matmul %9, %10, %cst_11 {dimension_numbers = #tpu.dot_dimension_numbers<[1], [0], [0], [1], [0, 0, 1, 1], [], []>} : vector<1x8xf32>, vector<8x16xf32>, vector<1x16xf32> -> vector<1x16xf32>
    %c0_12 = arith.constant 0 : index
    %c0_13 = arith.constant 0 : index
    %12 = vector.load %arg5[%c0_12, %c0_13] : memref<1x16xf32, #tpu.memory_space<vmem>>, vector<1x16xf32>
    %13 = arith.addf %11, %12 : vector<1x16xf32>
    %14 = arith.negf %13 : vector<1x16xf32>
    %15 = math.exp %14 : vector<1x16xf32>
    %cst_14 = arith.constant 1.000000e+00 : f32
    %16 = vector.broadcast %cst_14 : f32 to vector<1x16xf32>
    %17 = arith.addf %16, %15 : vector<1x16xf32>
    %18 = arith.divf %16, %17 : vector<1x16xf32>
    %19 = vector.shape_cast %18 : vector<1x16xf32> to vector<1x16x1xf32>
    %20 = vector.broadcast %19 : vector<1x16x1xf32> to vector<1x16x256xf32>
    %21 = arith.mulf %0, %20 : vector<1x16x256xf32>
    %c0_15 = arith.constant 0 : index
    %c0_16 = arith.constant 0 : index
    %c0_17 = arith.constant 0 : index
    %22 = vector.load %arg6[%c0_15, %c0_16, %c0_17] : memref<1x16x256xf32, #tpu.memory_space<vmem>>, vector<1x16x256xf32>
    tpu.vector_store %arg6[%c0_15, %c0_16, %c0_17], %21 {strides = array<i32>} : memref<1x16x256xf32, #tpu.memory_space<vmem>>, vector<1x16x256xf32>,
    return
  }
  func.func @transform_0(%arg0: i32) -> (i32, i32, i32) {
    %c0_i32 = arith.constant 0 : i32
    %c0_i32_0 = arith.constant 0 : i32
    %c0_i32_1 = arith.constant 0 : i32
    return %arg0, %c0_i32, %c0_i32_0 : i32, i32, i32
  }
  func.func @transform_1(%arg0: i32) -> (i32, i32) {
    %c0_i32 = arith.constant 0 : i32
    %c0_i32_0 = arith.constant 0 : i32
    %c0_i32_1 = arith.constant 0 : i32
    return %c0_i32, %c0_i32_0 : i32, i32
  }
  func.func @transform_2(%arg0: i32) -> (i32, i32) {
    %c0_i32 = arith.constant 0 : i32
    %c0_i32_0 = arith.constant 0 : i32
    %c0_i32_1 = arith.constant 0 : i32
    return %c0_i32, %c0_i32_0 : i32, i32
  }
  func.func @transform_3(%arg0: i32) -> (i32, i32) {
    %c0_i32 = arith.constant 0 : i32
    %c0_i32_0 = arith.constant 0 : i32
    %c0_i32_1 = arith.constant 0 : i32
    return %c0_i32, %c0_i32_0 : i32, i32
  }
  func.func @transform_4(%arg0: i32) -> (i32, i32) {
    %c0_i32 = arith.constant 0 : i32
    %c0_i32_0 = arith.constant 0 : i32
    %c0_i32_1 = arith.constant 0 : i32
    return %c0_i32, %c0_i32_0 : i32, i32
  }
  func.func @transform_5(%arg0: i32) -> (i32, i32, i32) {
    %c0_i32 = arith.constant 0 : i32
    %c0_i32_0 = arith.constant 0 : i32
    %c0_i32_1 = arith.constant 0 : i32
    return %arg0, %c0_i32, %c0_i32_0 : i32, i32, i32
  }
}

</mosaic_0001>

<bundles_post_ra>
// kernel: tpu_custom_call.1
= control target key start
LH: loop header
LB: loop body
LE: loop exit
PB: predicated region body
PF: predicated region fallthrough
CT: control target
= control target key end

     0   :  { %10 = vsyncpa [#allocation3], 0  ;;  %s957_s0 = inlined_call_operand.hbm [shape: f32[2,16,256], index: 0, kind: input, shape index: {}]   ;;  %s958_s1 = inlined_call_operand.vmem [shape: f32[16,8], index: 1, kind: input, shape index: {}]   ;;  %s959_s2 = inlined_call_operand.vmem [shape: f32[1,8], index: 2, kind: input, shape index: {}]   ;;  %s960_s3 = inlined_call_operand.vmem [shape: f32[8,16], index: 3, kind: input, shape index: {}]   ;;  %s961_s4 = inlined_call_operand.vmem [shape: f32[1,16], index: 4, kind: input, shape index: {}]   ;;  %s962_s5 = inlined_call_operand.hbm [shape: f32[2,16,256], index: 5, kind: output, shape index: {}]  }
   0x1   :  { %12 = vsyncpa [#allocation3 + $0x1], 0 }
   0x2   :  { %13 = vsyncpa [#allocation4], 0 }
   0x3   :  { %15 = vsyncpa [#allocation4 + $0x1], 0  ;;  %s768_s18 = smov 0   ;;  %s770_s19 = smov 0  }
   0x4   :  { %s772_s20 = smov 0   ;;  %s774_s21 = smov 0  }
   0x5 LB: > { %s789_s22 = sadd.s32 4294967295, %s727_s21   ;;  %s535_s23 = sadd.s32 4294967294, %s727_s21   ;;  %s727_s21 = sphi %s774_s21, %s975_s21   ;;  %s723_s20 = sphi %s772_s20, %s974_s20   ;;  %s719_s19 = sphi %s770_s19, %s973_s19   ;;  %s715_s18 = sphi %s768_s18, %s972_s18  }
   0x6   : > { %s793_s24 = sadd.s32 1, %s727_s21   ;;  %s28_s25 = sadd.s32 1, %s723_s20 }
   0x7   : > { %s25_s26 = ssub.s32 %s727_s21, %s793_s24  ;;  %p35_p0 = scmp.ne.s32.totalorder %s723_s20, %s719_s19 }
   0x8   : > { %p26_p1 = scmp.eq.s32.totalorder %s25_s26, 0  ;;  %p36_p2 = scmp.eq.s32.totalorder %s727_s21, 0 }
   0x9   : > { %p41_p3 = scmp.ne.s32.totalorder %s719_s19, %s715_s18  ;;  %p42_p4 = scmp.eq.s32.totalorder %s789_s22, 0 }
   0xa   : > { %s805_s27 = scalar_select %p26_p1, %s723_s20, %s28_s25  }
   0xb   : > { %p807_p5 = por %p36_p2, %p35_p0  ;;  %p811_p6 = por %p42_p4, %p41_p3 }
   0xc   : > { %p149_p7 = scmp.eq.s32.totalorder %s789_s22, 1  ;;  %p155_p8 = scmp.eq.s32.totalorder %s535_s23, 1 }
   0xd   : > { %p586_p10 = scmp.lt.s32.totalorder %s727_s21, 2  ;;  %s187_s7 = sand.u32 1, %s723_s20  }
   0xe   : > { %p818_p11 = por %p149_p7, %p35_p0  ;;  %p822_p12 = por %p155_p8, %p41_p3 }
   0xf   : > { %s552_s8 = sshll.u32 %s727_s21, 9  ;;  %s538_s9 = sshll.u32 %s187_s7, 5 }
  0x10   : > { %s966_s30 = scalar_select %p818_p11, 1, 0 }
  0x11   : > { %s967_s6 = scalar_select %p822_p12, 1, 0 }
  0x12   : > { %s831_s12 = scalar_lea.hbm %s957_s0, %s552_s8  ;;  %s191_s13 = scalar_lea.vmem [#allocation2], %s538_s9 }
  0x13   : > { %s198_s14 = sshll.u32 %s191_s13, 4  ;;  %p835_p13 = pnand %p586_p10, %p807_p5  ;;  %s839_s14 = int_to_ptr.vmem [resolvable:$true] %s198_s14 }
  0x14   : > { %s841_s16 = scalar_lea.sflag [#allocation3], %s187_s7  ;;  %s631_s17 = scalar_lea.hbm %s831_s12, 512 }
  0x15   : > { %p632_p0 = scmp.ne.s32.totalorder %s831_s12, %s631_s17  ;;  %p633_p1 = pneg %p835_p13 }
  0x16   : > { %s636_s26 = scalar_lea.hbm %s957_s0, 1024  ;;  %p637_p4 = scmp.lt.u32.totalorder %s831_s12, %s957_s0 }
  0x17   : > { %p634_p2 = pnand %p633_p1, %p632_p0  ;;  %p638_p5 = scmp.lt.u32.totalorder %s636_s26, %s631_s17 }
  0x18   : > { %p640_p8 = scmp.lt.u32.totalorder %s631_s17, %s831_s12 }
  0x19   : > { %p635_p3 = pneg %p634_p2  ;;  %p639_p7 = por %p638_p5, %p637_p4 }
  0x1b   : > { %p641_p10 = por %p640_p8, %p639_p7 }
  0x1d   : > { %p642_p9 = pnand %p641_p10, %p635_p3 }
  0x1f   : > { %645 = shalt.err (!%p642_p9)
}
  0x20   : > { %s646_s7 = scalar_lea.vmem %s839_s14, 512  ;;  %s729_s9 = smov [#allocation2]  }
  0x21   : > { %p647_p0 = scmp.ne.s32.totalorder %s839_s14, %s646_s7  ;;  %s651_s10 = sshll.u32 %s729_s9, 4  ;;  %s652_s10 = int_to_ptr.vmem [resolvable:$false] %s651_s10 }
  0x22   : > { %s653_s11 = scalar_lea.vmem %s652_s10, 1024  ;;  %p654_p11 = scmp.lt.s32.totalorder %s839_s14, %s652_s10 }
  0x23   : > { %p649_p2 = pnand %p647_p0, %p633_p1  ;;  %p655_p4 = scmp.lt.s32.totalorder %s653_s11, %s646_s7 }
  0x25   : > { %p650_p12 = pneg %p649_p2  ;;  %p656_p5 = por %p655_p4, %p654_p11 }
  0x27   : > { %p657_p7 = pnand %p656_p5, %p650_p12 }
  0x29   : > { %660 = shalt.err (!%p657_p7)
}
  0x2a   : > { %s730_s13 = smov 256   ;;  %s731_s17 = smov 16  }
  0x2b   : > { %581 = dma.hbm_to_vmem [thread:$0]  (!%p835_p13), %s831_s12, 512, %s839_s14, %s841_s16, %s730_s13, %s730_s13, %s731_s17  }
  0x2c   : > { %p541_p9 = scmp.ge.s32.totalorder %s727_s21, 1  ;;  %p206_p1 = scmp.lt.s32.totalorder %s727_s21, 3 }
  0x2e   : > { %p207_p3 = pnand %p541_p9, %p206_p1 }
  0x2f   : > { %s872_s23 = sand.u32 (!%p207_p3), 1, %s719_s19  }
  0x30   : > { %210 = sbr.rel (%p207_p3) target bundleno = 804 (0x324), region = 40  ;;  %s542_s25 = sshll.u32 (!%p207_p3), %s872_s23, 5 }
  0x31   : > { %s213_s26 = scalar_lea.sflag (!%p207_p3), [#allocation3], %s872_s23  ;;  %s216_s28 = scalar_lea.vmem (!%p207_p3), [#allocation2], %s542_s25 }
  0x37   : > { %706 = dma.done.wait (%p811_p6), %s213_s26, 512  }
  0x38   : > { %708 = vsyncadd (%p811_p6), %s213_s26, 4294966784  ;;  %v243_v0 = vld [vmem:[%s216_s28] sm:$0xff]  ;;  %v244_v1 = vld [vmem:[%s216_s28 + $0x8] sm:$0xff]  ;;  %v732_v9 = vmov 0.0|0.0   ;;  %vm733_vm0 = vmmov 0   ;;  %v734_v10 = vmov 0.0   ;;  %v260_v11 = vlaneseq }
  0x39   : > { %v882_v2 = vld [vmem:[%s216_s28 + $0x10] sm:$0xff]  ;;  %v247_v3 = vadd.f32 %v244_v1, %v243_v0  ;;  %v884_v4 = vld [vmem:[%s216_s28 + $0x18] sm:$0xff]  ;;  %v255_v6 = vld [vmem:[%s958_s1] sm:$0xff]  ;;  %571 = vmatprep.subr.bf16.mxu0 %v732_v9  ;;  %563 = vmatprep.mubr.msk.f32.mxu0 %vm733_vm0, %v734_v10  ;;  %vm271_vm1 = vcmask 130112   ;;  %vm273_vm2 = vcmask 130048   ;;  %vm349_vm3 = vcmask 64512  }
  0x3a   : > { %v250_v5 = vadd.f32 %v884_v4, %v882_v2  ;;  %v256_v7 = vld [vmem:[%s958_s1 + $0x8] sm:$0xff]  ;;  %566 = vmatprep.subr.mxu1 %v734_v10  ;;  %568 = vmatprep.mubr.msk.f32.mxu1 %vm733_vm0, %v734_v10  ;;  %v261_v12 = vand.u32 127, %v260_v11  ;;  %v263_v13 = vshrl.u32 %v260_v11, 7  ;;  %v347_v24 = vld [vmem:[%s960_s3] sm:$0xff]  ;;  %s242_s13 = scalar_lea.vmem [#allocation5], %s542_s25  ;;  %s553_s26 = sshll.u32 %s789_s22, 9 }
  0x3b   : > { %248 = vadd.xlane.f32.xlu0 %v247_v3  ;;  %v572_v8 = vpack.c.bf16 %v256_v7, %v255_v6  ;;  %567 = vmatpush3.msra.mxu1 %v347_v24  ;;  %v257_v25 = vld [vmem:[%s959_s2] sm:$0x1]  ;;  %s462_s17 = sshll.u32 %s242_s13, 4  ;;  %s911_s14 = scalar_lea.hbm %s962_s5, %s553_s26  ;;  %s906_s17 = int_to_ptr.vmem [resolvable:$true] %s462_s17 }
  0x3c   : > { %v266_v14 = vadd.s32 4294967288, %v261_v12  ;;  %v264_v16 = vsub.s32 %v261_v12, %v263_v13  ;;  %v348_v30 = vld [vmem:[%s961_s4] sm:$0x1]  ;;  %v431_v37 = vsub.s32 0, %v263_v13  ;;  %s449_s22 = scalar_lea.sflag [#allocation4], %s872_s23  ;;  %s661_s25 = scalar_lea.vmem %s906_s17, 512 }
  0x3d   : > { %573 = vmatpush3.bf16.msra.mxu0 %v572_v8  ;;  %p662_p6 = scmp.ne.s32.totalorder %s906_s17, %s661_s25  ;;  %p969_p11 = scmp.ne.s32.totalorder %s966_s30, 0 }
  0x3e   : > { %v269_v18 = vsub.s32 %v266_v14, %v263_v13  ;;  %s735_s15 = smov [#allocation5]  }
  0x3f   : > { %251 = vadd.xlane.f32.xlu0 %v250_v5  ;;  %p663_p12 = pnand %p662_p6, %p969_p11  ;;  %s665_s16 = sshll.u32 %s735_s15, 4  ;;  %s666_s16 = int_to_ptr.vmem [resolvable:$false] %s665_s16 }
  0x40   : > { %s667_s29 = scalar_lea.vmem %s666_s16, 1024  ;;  %p668_p8 = scmp.lt.s32.totalorder %s906_s17, %s666_s16 }
  0x41   : > { %p664_p13 = pneg %p663_p12  ;;  %p669_p10 = scmp.lt.s32.totalorder %s667_s29, %s661_s25 }
  0x43   : > { %p670_p0 = por %p669_p10, %p668_p8 }
  0x45   : > { %p671_p2 = pnand %p670_p0, %p664_p13 }
  0xc8   : > { %v249_v15 = vpop.xlane.xlu0 %248 }
  0xc9   : > { %v253_v17 = vmul.f32 0.005, %v249_v15 }
  0xcb   : > { %v265_v21 = vrot.slane %v253_v17, %v264_v16 }
  0xcc   : > { %v252_v19 = vpop.xlane.xlu0 %251 }
  0xcd   : > { %v254_v20 = vmul.f32 0.005, %v252_v19 }
  0xcf   : > { %v270_v22 = vrot.slane %v254_v20, %v269_v18 }
  0xd1   : > { %v272_v23 = vsel %vm271_vm1, %v270_v22, %v265_v21 }
  0xd2   : > { %564 = vmatmul.mubr.msk.f32.vlgmr.msra.gmra.mrb[0].mxu0 %vm273_vm2, %v272_v23 }
 0x1a5   : > { %v342_v26 = vpop.f32.mrb[0].mxu0 }
 0x1a6   : > { %v343_v27 = vadd.f32 %v342_v26, %v257_v25  ;;  %v565_v28 = vpop.f32.mrb[1].mxu0 }
 0x1a8   : > { %v346_v29 = vmax.f32 %v343_v27, 0.0 }
 0x1aa   : > { %569 = vmatmul.mubr.msk.f32.vlgmr.msra.gmra.mrb[0].mxu1 %vm349_vm3, %v346_v29 }
 0x27d   : > { %v419_v31 = vpop.f32.mrb[0].mxu1 }
 0x27e   : > { %v420_v32 = vadd.f32 %v419_v31, %v348_v30  ;;  %v570_v33 = vpop.f32.mrb[1].mxu1 }
 0x280   : > { %v546_v34 = vmul.f32 -1.442695, %v420_v32 }
 0x282   : > { %627 = vpow2.f32 %v546_v34 }
 0x28c   : > { %v628_v35 = vpop.eup %627 }
 0x28d   : > { %v426_v36 = vadd.f32 1.0, %v628_v35 }
 0x28f   : > { %629 = vrcp.f32 %v426_v36 }
 0x299   : > { %v630_v38 = vpop.eup %629 }
 0x29a   : > { %v432_v39 = vrot.slane %v630_v38, %v431_v37 }
 0x29c   : > { %434 = vbcast.lane.b32.xlu1 %v432_v39, 256 }
 0x2a0   : > { %438 = vbcast.lane.b32.xlu1 %v432_v39, 264 }
 0x30e   : > { %v435_v40 = vpop.permute.xlu1 %434 }
 0x30f   : > { %v440_v41 = vmul.f32 %v435_v40, %v243_v0  ;;  %v441_v42 = vmul.f32 %v435_v40, %v244_v1 }
 0x311   : > { %444 = vst [vmem:[%s242_s13] sm:$0xff] %v440_v41  ;;  %445 = vst [vmem:[%s242_s13 + $0x8] sm:$0xff] %v441_v42 }
 0x312   : > { %v439_v43 = vpop.permute.xlu1 %438 }
 0x313   : > { %v442_v44 = vmul.f32 %v439_v43, %v882_v2  ;;  %v443_v45 = vmul.f32 %v439_v43, %v884_v4 }
 0x315   : > { %446 = vst [vmem:[%s242_s13 + $0x10] sm:$0xff] %v442_v44  ;;  %447 = vst [vmem:[%s242_s13 + $0x18] sm:$0xff] %v443_v45 }
 0x316   : > { %674 = shalt.err (!%p671_p2)
}
 0x317   : > { %s675_s8 = scalar_lea.hbm %s911_s14, 512  ;;  %s679_s10 = scalar_lea.hbm %s962_s5, 1024 }
 0x318   : > { %p676_p4 = scmp.ne.s32.totalorder %s911_s14, %s675_s8  ;;  %p680_p9 = scmp.lt.u32.totalorder %s911_s14, %s962_s5 }
 0x319   : > { %p681_p1 = scmp.lt.u32.totalorder %s679_s10, %s675_s8  ;;  %p683_p6 = scmp.lt.u32.totalorder %s675_s8, %s911_s14 }
 0x31a   : > { %p677_p5 = pnand %p676_p4, %p969_p11 }
 0x31b   : > { %p682_p3 = por %p681_p1, %p680_p9 }
 0x31c   : > { %p678_p7 = pneg %p677_p5 }
 0x31d   : > { %p684_p12 = por %p683_p6, %p682_p3 }
 0x31f   : > { %p685_p13 = pnand %p684_p12, %p678_p7 }
 0x321   : > { %688 = shalt.err (!%p685_p13)
}
 0x322   : > { %s736_s26 = smov 256   ;;  %s737_s28 = smov 16  }
 0x323   : > { %576 = dma.vmem_to_hbm [thread:$0]  (%p969_p11), %s906_s17, 512, %s911_s14, %s449_s22, %s736_s26, %s736_s26, %s737_s28  }
 0x324 PF: > { %s477_s12 = sand.u32 1, %s715_s18   ;;  %p970_p8 = scmp.ne.s32.totalorder %s967_s6, 0 }
 0x325   : > { %p971_p10 = scmp.ge.s32.totalorder %s727_s21, 2  ;;  %s478_s25 = scalar_lea.sflag [#allocation4], %s477_s12 }
 0x327   : > { %p583_p0 = pnand %p971_p10, %p970_p8 }
 0x329   : > { %710 = dma.done.wait (!%p583_p0), %s478_s25, 512  }
 0x32a   : > { %712 = vsyncadd (!%p583_p0), %s478_s25, 4294966784  ;;  %p18_p2 = scmp.ge.s32.totalorder %s793_s24, 4   ;;  %s972_s18 = smov %s719_s19 }
 0x32b   : > { %s973_s19 = smov %s723_s20  ;;  %s974_s20 = smov %s805_s27 }
 0x32c   : > { %s975_s21 = smov %s793_s24  ;;  %20 = sbr.rel (!%p18_p2) target bundleno = 5 (0x5), region = 85 }
 0x333   :  { %483 = vsyncpa [#allocation3], 1 }
 0x334   :  { %485 = vsyncpa [#allocation3 + $0x1], 1 }
 0x335   :  { %486 = vsyncpa [#allocation4], 1 }
 0x336   :  { %488 = vsyncpa [#allocation4 + $0x1], 1 }

</bundles_post_ra>
